<compile_context>
chip_gen: v7x
topology: tpu7x:2x2x1
jax: 0.10.0
libtpu: 0.0.40
codegen_flags: <defaults>
</compile_context>

<pallas_src>
import functools

import jax
import jax.numpy as jnp
from jax.experimental import pallas as pl
from jax.experimental.pallas import tpu as pltpu


def _gce_kernel(logits_ref, targets_ref, out_ref, acc_ref, *, q, n_rows,
                block_rows, tiles_per_shard, need_mask):
    # logits_ref:  (block_rows, C) input dtype, VMEM
    # targets_ref: (block_rows, 1) int32, VMEM
    # out_ref:     (1, 8, 128) float32, VMEM (one block per shard)
    # acc_ref:     (block_rows, 1) float32 VMEM scratch (per-shard running sum)
    t = pl.program_id(1)

    @pl.when(t == 0)
    def _():
        acc_ref[...] = jnp.zeros_like(acc_ref)

    # Upcast inside the kernel so HBM traffic stays at the input dtype.
    logits = logits_ref[...].astype(jnp.float32)                  # (bR, C)
    tgt = targets_ref[...]                                         # (bR, 1) int32

    # Numerically stable per-row log-sum-exp.
    row_max = jnp.max(logits, axis=1, keepdims=True)               # (bR, 1)
    shifted = logits - row_max                                     # (bR, C)
    sum_exp = jnp.sum(jnp.exp(shifted), axis=1, keepdims=True)     # (bR, 1)
    log_sum_exp = jnp.log(sum_exp)                                 # (bR, 1)

    # Fused "gather": masked reduce of the shifted logits (no one-hot tile).
    # NOTE: out-of-range targets silently yield logit_t = 0 instead of raising.
    col_ids = jax.lax.broadcasted_iota(jnp.int32, logits.shape, 1)
    logit_t_shifted = jnp.sum(
        jnp.where(col_ids == tgt, shifted, 0.0), axis=1, keepdims=True)  # (bR, 1)

    # ce = lse - logit_t ;  weight = p_t**q * q = exp(-q*ce) * q
    # TODO(synk): if a VJP is ever added, `weight` must be stop-gradiented to
    # match torch (p is detached before Yg**q).
    ce = log_sum_exp - logit_t_shifted                             # (bR, 1)
    weight = jnp.exp(jnp.float32(-q) * ce) * jnp.float32(q)        # (bR, 1)
    loss = ce * weight                                             # (bR, 1)

    if need_mask:
        # Only emitted when the batch does not divide evenly into shard*tile:
        # masks ragged trailing rows and fully-padded (clamped) tiles.
        g = pl.program_id(0) * tiles_per_shard + t                 # global tile id
        row_ids = g * block_rows + jax.lax.broadcasted_iota(
            jnp.int32, loss.shape, 0)
        loss = jnp.where(row_ids < n_rows, loss, 0.0)

    acc_ref[...] += loss

    @pl.when(t == tiles_per_shard - 1)
    def _():
        shard_sum = jnp.sum(acc_ref[...])
        out_ref[...] = jnp.full(out_ref.shape, shard_sum, dtype=jnp.float32)


def _round_down(x, m):
    return max(m, (x // m) * m)


def generalized_ce_loss(logits, targets, q=0.7, block_rows=None, num_shards=None):
    """Pallas TPU implementation of GeneralizedCELoss.forward.

    logits:  (N, C) float array.  Keep it in its native dtype (bf16 welcome —
             the f32 upcast happens inside the kernel; do NOT pre-cast).
    targets: (N,)   int array of class indices (assumed in range).
    returns: scalar float32 (mean GCE loss).
    """
    # TODO(synk): torch's host-side NaN checks (raise NameError) have no
    # in-kernel equivalent and are omitted.
    N, C = logits.shape
    itemsize = jnp.dtype(logits.dtype).itemsize
    # Real sublane minimum for this dtype: 8 (f32), 16 (bf16), 32 (int8/fp8).
    sublane_min = 8 * max(1, 4 // itemsize)

    if block_rows is None:
        # ~4 MiB per logits tile of *input* dtype => ~8 MiB double-buffered,
        # plus in-kernel f32 intermediates, comfortably under the 48 MiB
        # scoped limit on every generation (v5e/v6e 128 MiB, v7x 64 MiB).
        target_bytes = 4 * 1024 * 1024
        block_rows = max(sublane_min, target_bytes // max(C * itemsize, 1))
    # TODO(synk): for class counts so large that even a sublane_min-row tile
    # exceeds the VMEM budget, add an 'arbitrary' class-axis grid with
    # online-softmax accumulation (running max / sum_exp / target logit).

    if block_rows >= N:
        block_rows = N                           # full-extent block is always legal
    else:
        block_rows = _round_down(block_rows, sublane_min)

    num_tiles = pl.cdiv(N, block_rows)
    # Shard the batch across (up to) 2 TensorCores: a real win on v7x
    # (2 TC/chip); on v5e/v6e it is just an extra accumulator segment.
    if num_shards is None:
        num_shards = 2 if num_tiles >= 2 else 1
    num_shards = max(1, min(num_shards, num_tiles))
    tiles_per_shard = pl.cdiv(num_tiles, num_shards)

    # Exact cover => no ragged / padded tiles => skip the mask entirely.
    need_mask = (N % block_rows != 0) or (num_shards * tiles_per_shard != num_tiles)

    last_block = num_tiles - 1

    def row_block(s, t):
        # Clamp fully-out-of-range tiles of the last shard (they are zeroed by
        # the in-kernel row mask); keeps every DMA in bounds.
        g = jnp.minimum(s * tiles_per_shard + t, last_block)
        return (g, 0)

    tgt2d = targets.astype(jnp.int32).reshape(N, 1)

    cost = pl.CostEstimate(
        flops=6 * N * C,
        transcendentals=N * C,
        bytes_accessed=N * C * itemsize + 4 * N + num_shards * 8 * 128 * 4,
    )

    out = pl.pallas_call(
        functools.partial(
            _gce_kernel, q=q, n_rows=N, block_rows=block_rows,
            tiles_per_shard=tiles_per_shard, need_mask=need_mask),
        out_shape=jax.ShapeDtypeStruct((num_shards, 8, 128), jnp.float32),
        grid=(num_shards, tiles_per_shard),
        in_specs=[
            pl.BlockSpec((block_rows, C), row_block),
            pl.BlockSpec((block_rows, 1), row_block),
        ],
        out_specs=pl.BlockSpec((1, 8, 128), lambda s, t: (s, 0, 0)),
        scratch_shapes=[pltpu.VMEM((block_rows, 1), jnp.float32)],
        compiler_params=pltpu.CompilerParams(
            dimension_semantics=("parallel", "arbitrary"),
            vmem_limit_bytes=48 * 1024 * 1024,
        ),
        cost_estimate=cost,
    )(logits, tgt2d)

    # Each shard wrote its (broadcast) partial sum; finish sum + mean here.
    return jnp.sum(out[:, 0, 0]) * jnp.float32(1.0 / N)


def _reference(logits, targets, q=0.7):
    """Pure-JAX reference mirroring the PyTorch forward."""
    logits = logits.astype(jnp.float32)
    logp = jax.nn.log_softmax(logits, axis=1)
    p = jnp.exp(logp)
    yg = jnp.take_along_axis(p, targets[:, None], axis=1)[:, 0]
    weight = yg ** q * q
    ce = -jnp.take_along_axis(logp, targets[:, None], axis=1)[:, 0]
    return jnp.mean(ce * weight)


if __name__ == "__main__":
    key = jax.random.PRNGKey(0)
    k1, k2, k3, k4, k5, k6 = jax.random.split(key, 6)

    # Small single-tile case: batch=8, classes=16, f32.
    N, C = 8, 16
    logits = jax.random.normal(k1, (N, C), dtype=jnp.float32)
    targets = jax.random.randint(k2, (N,), 0, C, dtype=jnp.int32)
    out = jax.block_until_ready(generalized_ce_loss(logits, targets, q=0.7))
    ref = _reference(logits, targets, q=0.7)
    assert jnp.allclose(out, ref, rtol=1e-5, atol=1e-5), (out, ref)

    # Multi-tile, two shards, uneven shard split (exercises clamped padded tile).
    N2, C2 = 48, 128
    logits2 = jax.random.normal(k3, (N2, C2), dtype=jnp.float32)
    targets2 = jax.random.randint(k4, (N2,), 0, C2, dtype=jnp.int32)
    out2 = jax.block_until_ready(
        generalized_ce_loss(logits2, targets2, q=0.7, block_rows=16))
    ref2 = _reference(logits2, targets2, q=0.7)
    assert jnp.allclose(out2, ref2, rtol=1e-4, atol=1e-5), (out2, ref2)

    # bf16 streaming + ragged trailing tile (in-kernel upcast, row masking).
    N3, C3 = 40, 256
    logits3 = jax.random.normal(k5, (N3, C3), dtype=jnp.float32).astype(jnp.bfloat16)
    targets3 = jax.random.randint(k6, (N3,), 0, C3, dtype=jnp.int32)
    out3 = jax.block_until_ready(
        generalized_ce_loss(logits3, targets3, q=0.7, block_rows=16))
    ref3 = _reference(logits3, targets3, q=0.7)
    assert jnp.allclose(out3, ref3, rtol=1e-4, atol=1e-4), (out3, ref3)

    print("KERNEL_OK")
</pallas_src>

<mosaic_0001>
module attributes {stable_mosaic.version = 11 : i64} {
  func.func @_gce_kernel(%arg0: i32, %arg1: i32, %arg2: memref<8x16xf32, #tpu.memory_space<vmem>>, %arg3: memref<8x1xi32, #tpu.memory_space<vmem>>, %arg4: memref<1x8x128xf32, #tpu.memory_space<vmem>>, %arg5: memref<8x1xf32, #tpu.memory_space<vmem>>) attributes {dimension_semantics = [#tpu.dimension_semantics<parallel>, #tpu.dimension_semantics<arbitrary>], iteration_bounds = array<i64: 1, 1>, scalar_prefetch = 0 : i64, scratch_operands = 1 : i64, tpu.core_type = #tpu.core_type<tc>, window_params = [{transform_indices = @transform_0, window_bounds = array<i64: 8, 16>}, {transform_indices = @transform_1, window_bounds = array<i64: 8, 1>}, {transform_indices = @transform_2, window_bounds = array<i64: 1, 8, 128>}]} {
    %c0_i32 = arith.constant 0 : i32
    %0 = arith.cmpi eq, %arg1, %c0_i32 : i32
    %1 = arith.extui %0 : i1 to i32
    %c0_i32_0 = arith.constant 0 : i32
    %2 = arith.cmpi ne, %1, %c0_i32_0 : i32
    scf.if %2 {
      %cst_15 = arith.constant 0.000000e+00 : f32
      %33 = vector.broadcast %cst_15 : f32 to vector<8x1xf32>
      %c0_16 = arith.constant 0 : index
      %c0_17 = arith.constant 0 : index
      %34 = vector.load %arg5[%c0_16, %c0_17] : memref<8x1xf32, #tpu.memory_space<vmem>>, vector<8x1xf32>
      tpu.vector_store %arg5[%c0_16, %c0_17], %33 {strides = array<i32>} : memref<8x1xf32, #tpu.memory_space<vmem>>, vector<8x1xf32>,
    } else {
    }
    %c0 = arith.constant 0 : index
    %c0_1 = arith.constant 0 : index
    %3 = vector.load %arg2[%c0, %c0_1] : memref<8x16xf32, #tpu.memory_space<vmem>>, vector<8x16xf32>
    %c0_2 = arith.constant 0 : index
    %c0_3 = arith.constant 0 : index
    %4 = vector.load %arg3[%c0_2, %c0_3] : memref<8x1xi32, #tpu.memory_space<vmem>>, vector<8x1xi32>
    %cst = arith.constant dense<0xFF800000> : vector<8xf32>
    %5 = vector.multi_reduction <maximumf>, %3, %cst [1] : vector<8x16xf32> to vector<8xf32>
    %6 = vector.shape_cast %5 : vector<8xf32> to vector<8x1xf32>
    %7 = vector.broadcast %6 : vector<8x1xf32> to vector<8x16xf32>
    %8 = arith.subf %3, %7 : vector<8x16xf32>
    %9 = math.exp %8 : vector<8x16xf32>
    %cst_4 = arith.constant dense<0.000000e+00> : vector<8xf32>
    %10 = vector.multi_reduction <add>, %9, %cst_4 [1] : vector<8x16xf32> to vector<8xf32>
    %11 = vector.shape_cast %10 : vector<8xf32> to vector<8x1xf32>
    %12 = math.log %11 : vector<8x1xf32>
    %13 = tpu.iota {dimensions = array<i32: 1>} : vector<8x16xi32>
    %14 = vector.broadcast %4 : vector<8x1xi32> to vector<8x16xi32>
    %15 = arith.cmpi eq, %13, %14 : vector<8x16xi32>
    %cst_5 = arith.constant 0.000000e+00 : f32
    %16 = vector.broadcast %cst_5 : f32 to vector<8x16xf32>
    %17 = arith.select %15, %8, %16 : vector<8x16xi1>, vector<8x16xf32>
    %cst_6 = arith.constant dense<0.000000e+00> : vector<8xf32>
    %18 = vector.multi_reduction <add>, %17, %cst_6 [1] : vector<8x16xf32> to vector<8xf32>
    %19 = vector.shape_cast %18 : vector<8xf32> to vector<8x1xf32>
    %20 = arith.subf %12, %19 : vector<8x1xf32>
    %cst_7 = arith.constant -0.699999988 : f32
    %21 = vector.broadcast %cst_7 : f32 to vector<8x1xf32>
    %22 = arith.mulf %21, %20 : vector<8x1xf32>
    %23 = math.exp %22 : vector<8x1xf32>
    %cst_8 = arith.constant 0.699999988 : f32
    %24 = vector.broadcast %cst_8 : f32 to vector<8x1xf32>
    %25 = arith.mulf %23, %24 : vector<8x1xf32>
    %26 = arith.mulf %20, %25 : vector<8x1xf32>
    %c0_9 = arith.constant 0 : index
    %c0_10 = arith.constant 0 : index
    %27 = vector.load %arg5[%c0_9, %c0_10] : memref<8x1xf32, #tpu.memory_space<vmem>>, vector<8x1xf32>
    %28 = arith.addf %27, %26 : vector<8x1xf32>
    %c0_11 = arith.constant 0 : index
    %c0_12 = arith.constant 0 : index
    %29 = vector.load %arg5[%c0_11, %c0_12] : memref<8x1xf32, #tpu.memory_space<vmem>>, vector<8x1xf32>
    tpu.vector_store %arg5[%c0_11, %c0_12], %28 {strides = array<i32>} : memref<8x1xf32, #tpu.memory_space<vmem>>, vector<8x1xf32>,
    %c0_i32_13 = arith.constant 0 : i32
    %30 = arith.cmpi eq, %arg1, %c0_i32_13 : i32
    %31 = arith.extui %30 : i1 to i32
    %c0_i32_14 = arith.constant 0 : i32
    %32 = arith.cmpi ne, %31, %c0_i32_14 : i32
    scf.if %32 {
      %c0_15 = arith.constant 0 : index
      %c0_16 = arith.constant 0 : index
      %33 = vector.load %arg5[%c0_15, %c0_16] : memref<8x1xf32, #tpu.memory_space<vmem>>, vector<8x1xf32>
      %34 = vector.shape_cast %33 : vector<8x1xf32> to vector<1x8x1xf32>
      %cst_17 = arith.constant dense<0.000000e+00> : vector<1xf32>
      %35 = vector.multi_reduction <add>, %34, %cst_17 [1, 2] : vector<1x8x1xf32> to vector<1xf32>
      %36 = vector.shape_cast %35 : vector<1xf32> to vector<1x1x1xf32>
      %37 = vector.extract %36[0, 0, 0] : f32 from vector<1x1x1xf32>
      %38 = vector.broadcast %37 : f32 to vector<1x8x128xf32>
      %c0_18 = arith.constant 0 : index
      %c0_19 = arith.constant 0 : index
      %c0_20 = arith.constant 0 : index
      %39 = vector.load %arg4[%c0_18, %c0_19, %c0_20] : memref<1x8x128xf32, #tpu.memory_space<vmem>>, vector<1x8x128xf32>
      tpu.vector_store %arg4[%c0_18, %c0_19, %c0_20], %38 {strides = array<i32>} : memref<1x8x128xf32, #tpu.memory_space<vmem>>, vector<1x8x128xf32>,
    } else {
    }
    return
  }
  func.func @transform_0(%arg0: i32, %arg1: i32) -> (i32, i32) {
    %c1_i32 = arith.constant 1 : i32
    %0 = arith.muli %arg0, %c1_i32 : i32
    %1 = arith.addi %0, %arg1 : i32
    %c0_i32 = arith.constant 0 : i32
    %2 = arith.minsi %1, %c0_i32 : i32
    %c0_i32_0 = arith.constant 0 : i32
    %c0_i32_1 = arith.constant 0 : i32
    return %2, %c0_i32_0 : i32, i32
  }
  func.func @transform_1(%arg0: i32, %arg1: i32) -> (i32, i32) {
    %c1_i32 = arith.constant 1 : i32
    %0 = arith.muli %arg0, %c1_i32 : i32
    %1 = arith.addi %0, %arg1 : i32
    %c0_i32 = arith.constant 0 : i32
    %2 = arith.minsi %1, %c0_i32 : i32
    %c0_i32_0 = arith.constant 0 : i32
    %c0_i32_1 = arith.constant 0 : i32
    return %2, %c0_i32_0 : i32, i32
  }
  func.func @transform_2(%arg0: i32, %arg1: i32) -> (i32, i32, i32) {
    %c0_i32 = arith.constant 0 : i32
    %c0_i32_0 = arith.constant 0 : i32
    %c0_i32_1 = arith.constant 0 : i32
    return %arg0, %c0_i32, %c0_i32_0 : i32, i32, i32
  }
}

</mosaic_0001>

<bundles_post_ra>
// kernel: tpu_custom_call.1
= control target key start
LH: loop header
LB: loop body
LE: loop exit
PB: predicated region body
PF: predicated region fallthrough
CT: control target
= control target key end

     0   :  { %vm74_vm0 = vcmask 130048   ;;  %s226_s0 = inlined_call_operand.vmem [shape: f32[8,16], index: 0, kind: input, shape index: {}]   ;;  %s227_s1 = inlined_call_operand.vmem [shape: s32[8,1], index: 1, kind: input, shape index: {}]   ;;  %s228_s2 = inlined_call_operand.hbm [shape: f32[1,8,128], index: 2, kind: output, shape index: {}]  }
   0x1   :  { %v72_v0 = vld [vmem:[%s226_s0] sm:$0xff] }
   0x2   :  { %7 = vsyncpa [#allocation4], 0  ;;  %v75_v1 = vsel %vm74_vm0, %v72_v0, -inf  ;;  %v184_v2 = vmov 0   ;;  %v73_v3 = vld [vmem:[%s227_s1] sm:$0xff]  ;;  %v86_v7 = vlaneseq  ;;  %vm70_vm2 = vcmask 7168  }
   0x3   :  { %153 = vset.pattern.permute.xlu0 %v184_v2  ;;  %v185_v14 = vmov 0.0   ;;  %s186_s0 = smov [#allocation3]  }
   0x4   :  { %76 = vmax.xlane.f32.xlu0 %v75_v1  ;;  %v87_v8 = vand.u32 127, %v86_v7  ;;  %71 = vst.msk [vmem:[#allocation2] sm:$0xff] %vm70_vm2, %v185_v14  ;;  %s128_s1 = sshll.u32 %s186_s0, 4  ;;  %s129_s1 = int_to_ptr.vmem [resolvable:$true] %s128_s1 }
   0x5   :  { %s160_s14 = scalar_lea.vmem %s129_s1, 128  ;;  %p165_p1 = scmp.lt.s32.totalorder %s129_s1, %s129_s1 }
   0x6   :  { %p161_p0 = scmp.ne.s32.totalorder %s129_s1, %s160_s14  ;;  %p166_p2 = scmp.lt.s32.totalorder %s160_s14, %s160_s14 }
   0x8   :  { %p167_p3 = por %p166_p2, %p165_p1 }
   0xa   :  { %p168_p4 = pnand %p167_p3, %p161_p0 }
   0xb   :  { %v102_v24 = vld [vmem:[#allocation2] sm:$0xff] }
  0x1a   :  { %89 = vperm.xlu0 %153, %v73_v3  }
  0x91   :  { %v77_v4 = vpop.xlane.xlu0 %76 }
  0x92   :  { %v78_v5 = vsub.f32 %v72_v0, %v77_v4 }
  0x94   :  { %v79_v6 = vmul.f32 1.442695, %v78_v5 }
  0x96   :  { %154 = vpow2.f32 %v79_v6 }
  0x99   :  { %v90_v9 = vpop.permute.xlu0 %89 }
  0x9a   :  { %vm91_vm1 = vcmp.eq.s32.totalorder %v87_v8, %v90_v9 }
  0x9b   :  { %v92_v12 = vsel %vm91_vm1, %v78_v5, 0.0 }
  0x9c   :  { %v93_v13 = vsel %vm74_vm0, %v92_v12, 0.0 }
  0xa0   :  { %v155_v10 = vpop.eup %154 }
  0xa1   :  { %v81_v11 = vsel %vm74_vm0, %v155_v10, 0.0 }
  0xa2   :  { %82 = vadd.xlane.f32.xlu1 %v81_v11 }
  0xa6   :  { %94 = vadd.xlane.f32.xlu1 %v93_v13 }
 0x12f   :  { %v83_v15 = vpop.xlane.xlu1 %82 }
 0x130   :  { %156 = vlog2.f32 %v83_v15 }
 0x133   :  { %v95_v18 = vpop.xlane.xlu1 %94 }
 0x13a   :  { %v157_v16 = vpop.eup %156 }
 0x13b   :  { %v85_v17 = vmul.f32 0.6931472, %v157_v16 }
 0x13d   :  { %v96_v19 = vsub.f32 %v85_v17, %v95_v18 }
 0x13f   :  { %v97_v20 = vmul.f32 -0.7, %v96_v19 }
 0x141   :  { %v98_v21 = vmul.f32 1.442695, %v97_v20 }
 0x143   :  { %158 = vpow2.f32 %v98_v21 }
 0x14d   :  { %v159_v22 = vpop.eup %158 }
 0x14e   :  { %v100_v23 = vmul.f32 0.7, %v159_v22 }
 0x150   :  { %v101_v25 = vmul.f32 %v100_v23, %v96_v19 }
 0x152   :  { %v103_v26 = vadd.f32 %v102_v24, %v101_v25 }
 0x154   :  { %105 = vst.msk [vmem:[#allocation2] sm:$0xff] %vm70_vm2, %v103_v26 }
 0x15b   :  { %v109_v27 = vld [vmem:[#allocation2] sm:$0xff] }
 0x15c   :  { %v110_v28 = vsel %vm70_vm2, %v109_v27, 0.0 }
 0x15d   :  { %111 = vadd.xlane.f32.xlu1 %v110_v28 }
 0x1ea   :  { %v112_v29 = vpop.xlane.xlu1 %111 }
 0x1eb   :  { %v113_v30 = vrot.slane %v112_v29, 4 }
 0x1ed   :  { %v114_v31 = vadd.f32 %v113_v30, %v112_v29 }
 0x1ef   :  { %v115_v32 = vrot.slane %v114_v31, 2 }
 0x1f1   :  { %v116_v33 = vadd.f32 %v115_v32, %v114_v31 }
 0x1f3   :  { %v117_v34 = vrot.slane %v116_v33, 1 }
 0x1f5   :  { %v118_v35 = vadd.f32 %v117_v34, %v116_v33 }
 0x1f7   :  { %148 = vpush %v118_v35 }
 0x228   :  { %s149_s13 = spop %148 }
 0x229   :  { %v120_v36 = vstv %s149_s13 }
 0x22a   :  { %121 = vst [vmem:[#allocation3] sm:$0xff] %v120_v36 }
 0x22b   :  { %171 = shalt.err (!%p168_p4)
}
 0x22c   :  { %s172_s17 = scalar_lea.hbm %s228_s2, 128 }
 0x22d   :  { %p173_p5 = scmp.ne.s32.totalorder %s228_s2, %s172_s17  ;;  %p176_p6 = scmp.lt.u32.totalorder %s172_s17, %s228_s2 }
 0x22f   :  { %p178_p7 = pnand %p176_p6, %p173_p5 }
 0x231   :  { %181 = shalt.err (!%p178_p7)
}
 0x232   :  { %131 = dma.vmem_to_hbm [thread:$0]  %s129_s1, 128, %s228_s2, [#allocation4]  }
 0x233   :  { %182 = dma.done.wait [#allocation4], 128  }
 0x234   :  { %183 = vsyncadd [#allocation4], 4294967168 }
 0x235   :  { %135 = vsyncpa [#allocation4], 1 }

</bundles_post_ra>
